<compile_context>
chip_gen: v6e
topology: v6e:2x2x1
jax: 0.10.0
libtpu: 0.0.40
codegen_flags: <defaults>
</compile_context>

<pallas_src>
import math
import functools

import jax
import jax.numpy as jnp
from jax import lax
from jax.experimental import pallas as pl
from jax.experimental.pallas import tpu as pltpu


VMEM_LIMIT_BYTES = 32 * 1024 * 1024


# ---------------------------------------------------------------------------
# In-kernel helpers (traced inside the Pallas bodies); f32 math.
# ---------------------------------------------------------------------------
def _gelu(x):
    # exact (erf) GELU, same as torch.nn.GELU() / F.gelu default
    return 0.5 * x * (1.0 + lax.erf(x * (1.0 / math.sqrt(2.0))))


def _layernorm(x, gamma, beta, eps=1e-5):
    mu = jnp.mean(x, axis=-1, keepdims=True)
    var = jnp.mean((x - mu) ** 2, axis=-1, keepdims=True)
    return (x - mu) * lax.rsqrt(var + eps) * gamma + beta


# ---------------------------------------------------------------------------
# Grid-invariant parameter BlockSpecs: single-buffered when supported.
# ---------------------------------------------------------------------------
def _probe_kernel(w_ref, o_ref):
    o_ref[...] = w_ref[...]


@functools.lru_cache(maxsize=None)
def _buffered_weights_supported():
    """Feature-probe pipeline_mode=pl.Buffered(1); fall back cleanly if absent."""
    try:
        out = pl.pallas_call(
            _probe_kernel,
            out_shape=jax.ShapeDtypeStruct((8, 128), jnp.float32),
            grid=(1,),
            in_specs=[pl.BlockSpec((8, 128), lambda i: (0, 0),
                                   pipeline_mode=pl.Buffered(1))],
            out_specs=pl.BlockSpec((8, 128), lambda i: (0, 0)),
        )(jnp.zeros((8, 128), jnp.float32))
        jax.block_until_ready(out)
        return True
    except Exception:
        return False


def _w_spec(shape, grid_rank):
    nd = len(shape)
    index_map = {1: (lambda b: (0,) * nd),
                 2: (lambda b, t: (0,) * nd)}[grid_rank]
    if _buffered_weights_supported():
        # Weights never change across the grid; one VMEM copy is enough.
        return pl.BlockSpec(shape, index_map, pipeline_mode=pl.Buffered(1))
    return pl.BlockSpec(shape, index_map)


def _compiler_params(semantics):
    return pltpu.CompilerParams(dimension_semantics=semantics,
                                vmem_limit_bytes=VMEM_LIMIT_BYTES)


# ---------------------------------------------------------------------------
# Kernel 1: grouped positional conv (+ SamePad truncation) + GELU
#           + residual add + post-LayerNorm.
#   The grouped conv is pre-packed as K block-diagonal (C, C) bf16 weights so
#   each MXU call has contraction C (instead of K*G tiny cg x cg matmuls).
# ---------------------------------------------------------------------------
def posconv_ln_kernel(xpad_ref, w_ref, b_ref, g_ref, beta_ref, out_ref,
                      *, T, K, pad):
    xp = xpad_ref[0]                     # (T + 2*pad, C) f32
    C = xp.shape[-1]
    x = xp[pad:pad + T, :]               # residual path (no duplicate HBM DMA)
    xp_bf = xp.astype(jnp.bfloat16)      # MXU operand

    acc = jnp.zeros((T, C), jnp.float32)
    for k in range(K):                   # static unroll over taps
        acc = acc + jnp.dot(xp_bf[k:k + T, :], w_ref[k],
                            preferred_element_type=jnp.float32)
    # bias + GELU hoisted out of the tap loop (nn.GELU after SamePad)
    conv = _gelu(acc + b_ref[...])
    y = x + conv                         # x += x_conv  (f32)
    # not layer_norm_first -> post LayerNorm right after positional conv
    out_ref[0] = _layernorm(y, g_ref[...], beta_ref[...])


# ---------------------------------------------------------------------------
# Kernel 2: self-attention + residual + self_attn_layer_norm (post-LN).
#   Head-batched (H, T, D) einsums; softmax in f32 with approx reciprocal.
# TODO(synk): at real WavLM scale (T >= 512) tile this over query/KV blocks
#             with an online-softmax accumulator so the (H, T, T) scores never
#             materialize in full; full-T scores are fine at this small config.
# ---------------------------------------------------------------------------
def attn_ln_kernel(x_ref, wq_ref, bq_ref, wk_ref, bk_ref, wv_ref, bv_ref,
                   wo_ref, bo_ref, g1_ref, b1_ref, out_ref, *, H, D, scaling):
    x = x_ref[0]                                         # (T, C) f32
    T = x.shape[0]
    xb = x.astype(jnp.bfloat16)

    q = jnp.dot(xb, wq_ref[...], preferred_element_type=jnp.float32) + bq_ref[...]
    q = q * scaling                                      # WavLM: scale q after bias
    k = jnp.dot(xb, wk_ref[...], preferred_element_type=jnp.float32) + bk_ref[...]
    v = jnp.dot(xb, wv_ref[...], preferred_element_type=jnp.float32) + bv_ref[...]

    # (T, C) -> (H, T, D): one head-batched matmul instead of H tiny ones.
    qh = q.reshape(T, H, D).transpose(1, 0, 2).astype(jnp.bfloat16)
    kh = k.reshape(T, H, D).transpose(1, 0, 2).astype(jnp.bfloat16)
    vh = v.reshape(T, H, D).transpose(1, 0, 2).astype(jnp.bfloat16)

    s = jnp.einsum('htd,hsd->hts', qh, kh,
                   preferred_element_type=jnp.float32)   # (H, T, T) f32
    s = s - jnp.max(s, axis=-1, keepdims=True)
    p = jnp.exp(s)
    p = p * pl.reciprocal(jnp.sum(p, axis=-1, keepdims=True), approx=True)
    ctx = jnp.einsum('hts,hsd->htd', p.astype(jnp.bfloat16), vh,
                     preferred_element_type=jnp.float32) # (H, T, D) f32

    attn = ctx.transpose(1, 0, 2).reshape(T, H * D).astype(jnp.bfloat16)
    attn = jnp.dot(attn, wo_ref[...],
                   preferred_element_type=jnp.float32) + bo_ref[...]

    y = x + attn                                         # residual (f32)
    out_ref[0] = _layernorm(y, g1_ref[...], b1_ref[...]) # self_attn_layer_norm


# ---------------------------------------------------------------------------
# Kernel 3: FFN (fc1 -> GELU -> fc2) + residual + final_layer_norm,
#           tiled over T rows (rows are independent).
# ---------------------------------------------------------------------------
def ffn_ln_kernel(x_ref, w1_ref, bf1_ref, w2_ref, bf2_ref, g2_ref, b2_ref,
                  out_ref):
    x = x_ref[0]                                         # (t_tile, C) f32
    xb = x.astype(jnp.bfloat16)
    h = _gelu(jnp.dot(xb, w1_ref[...],
                      preferred_element_type=jnp.float32) + bf1_ref[...])
    y = jnp.dot(h.astype(jnp.bfloat16), w2_ref[...],
                preferred_element_type=jnp.float32) + bf2_ref[...]
    y = x + y                                            # residual (f32)
    out_ref[0] = _layernorm(y, g2_ref[...], b2_ref[...]) # final_layer_norm


# ---------------------------------------------------------------------------
# Wrappers
# ---------------------------------------------------------------------------
def pos_conv_block(x, conv_w, conv_b, ln_g, ln_b, *, K):
    B, T, C = x.shape
    pad = K // 2
    # SamePad(K) with even K drops the trailing conv output; producing only T
    # outputs from the padded input is exactly equivalent.
    xpad = jnp.pad(x, ((0, 0), (pad, pad), (0, 0)))
    kern = functools.partial(posconv_ln_kernel, T=T, K=K, pad=pad)
    return pl.pallas_call(
        kern,
        out_shape=jax.ShapeDtypeStruct((B, T, C), jnp.float32),
        grid=(B,),
        in_specs=[pl.BlockSpec((1, T + 2 * pad, C), lambda b: (b, 0, 0)),
                  _w_spec(conv_w.shape, 1),
                  _w_spec(conv_b.shape, 1),
                  _w_spec(ln_g.shape, 1),
                  _w_spec(ln_b.shape, 1)],
        out_specs=pl.BlockSpec((1, T, C), lambda b: (b, 0, 0)),
        compiler_params=_compiler_params(("parallel",)),
    )(xpad, conv_w, conv_b, ln_g, ln_b)


def attention_block(x, lp, *, H):
    B, T, C = x.shape
    D = C // H
    scaling = D ** -0.5
    kern = functools.partial(attn_ln_kernel, H=H, D=D, scaling=scaling)
    names = ("wq", "bq", "wk", "bk", "wv", "bv", "wo", "bo", "g1", "b1")
    params = [lp[n] for n in names]
    return pl.pallas_call(
        kern,
        out_shape=jax.ShapeDtypeStruct((B, T, C), jnp.float32),
        grid=(B,),
        in_specs=[pl.BlockSpec((1, T, C), lambda b: (b, 0, 0))]
                 + [_w_spec(p.shape, 1) for p in params],
        out_specs=pl.BlockSpec((1, T, C), lambda b: (b, 0, 0)),
        compiler_params=_compiler_params(("parallel",)),
    )(x, *params)


def ffn_block(x, lp, *, t_tile):
    B, T, C = x.shape
    tq = t_tile if (t_tile is not None and T % t_tile == 0) else T
    names = ("w1", "bf1", "w2", "bf2", "g2", "b2")
    params = [lp[n] for n in names]
    return pl.pallas_call(
        ffn_ln_kernel,
        out_shape=jax.ShapeDtypeStruct((B, T, C), jnp.float32),
        grid=(B, T // tq),
        in_specs=[pl.BlockSpec((1, tq, C), lambda b, t: (b, t, 0))]
                 + [_w_spec(p.shape, 2) for p in params],
        out_specs=pl.BlockSpec((1, tq, C), lambda b, t: (b, t, 0)),
        compiler_params=_compiler_params(("parallel", "parallel")),
    )(x, *params)


def encoder_layer(x, lp, *, H, t_tile):
    # Post-LN TransformerSentenceEncoderLayer:
    #   MHA -> residual -> LN -> FFN(GELU) -> residual -> LN
    x = attention_block(x, lp, H=H)
    x = ffn_block(x, lp, t_tile=t_tile)
    return x


def transformer_encoder(x, params, *, K, H, t_tile=128):
    """Forward pass of TransformerEncoder (eval mode, no masks, tgt_layer=None)."""
    # padding_mask is None -> no zeroing; streaming_mask is None.
    x = pos_conv_block(x, params["conv_w"], params["conv_b"],
                       params["ln_g"], params["ln_b"], K=K)
    # dropout(p, training=False) is identity; layerdrop skipped in eval.
    layer_results = []   # tgt_layer is None -> stays empty (matches reference)
    # TODO(synk): at real scale, prefetch layer i+1 weights via a cross-call DMA
    #             (semaphore-valued output) to hide per-layer weight HBM traffic.
    for lp in params["layers"]:
        x = encoder_layer(x, lp, H=H, t_tile=t_tile)
    # layer_norm_first is False -> no extra final layer_norm in forward()
    return x, layer_results


# ---------------------------------------------------------------------------
# Deterministic parameter initialization (shapes from the module's __init__).
# Matmul weights stored in bf16 (MXU operands); biases / LN params in f32.
# ---------------------------------------------------------------------------
def init_params(key, *, C, F, K, G, L):
    cg = C // G
    keys = jax.random.split(key, 1 + 6 * L)

    # pos_conv: Conv1d(C, C, K, padding=K//2, groups=G), weight (C, C//G, K)
    std = math.sqrt(4.0 * 1.0 / (K * C))
    v = std * jax.random.normal(keys[0], (C, cg, K), jnp.float32)
    # weight_norm(dim=2): at init g = ||v||, so the effective weight == v.
    # Repack the grouped weight as K block-diagonal (C, C) matrices: the kernel
    # then runs K matmuls with contraction C (MXU-friendly) instead of K*G tiny
    # (cg x cg) matmuls + a lane-axis concatenate.  Trades a factor-G FLOP
    # redundancy for far better MXU occupancy / issue count.
    w_dense = jnp.zeros((K, C, C), jnp.float32)
    for g in range(G):
        blk = jnp.transpose(v[g * cg:(g + 1) * cg], (2, 1, 0))  # (K, cg_in, cg_out)
        w_dense = w_dense.at[:, g * cg:(g + 1) * cg, g * cg:(g + 1) * cg].set(blk)
    conv_w = w_dense.astype(jnp.bfloat16)
    conv_b = jnp.zeros((1, C), jnp.float32)

    ln_g = jnp.ones((1, C), jnp.float32)
    ln_b = jnp.zeros((1, C), jnp.float32)

    def lin(k, din, dout):
        # init_bert_params: normal(0, 0.02) weights, zero bias.
        # stored pre-transposed (din, dout) so kernels compute x @ W + b;
        # bf16 because these only ever feed the MXU.
        w = 0.02 * jax.random.normal(k, (din, dout), jnp.float32)
        return w.astype(jnp.bfloat16)

    layers = []
    for i in range(L):
        ks = keys[1 + 6 * i: 1 + 6 * (i + 1)]
        layers.append(dict(
            wq=lin(ks[0], C, C), bq=jnp.zeros((1, C), jnp.float32),
            wk=lin(ks[1], C, C), bk=jnp.zeros((1, C), jnp.float32),
            wv=lin(ks[2], C, C), bv=jnp.zeros((1, C), jnp.float32),
            wo=lin(ks[3], C, C), bo=jnp.zeros((1, C), jnp.float32),
            g1=jnp.ones((1, C), jnp.float32), b1=jnp.zeros((1, C), jnp.float32),
            w1=lin(ks[4], C, F), bf1=jnp.zeros((1, F), jnp.float32),
            w2=lin(ks[5], F, C), bf2=jnp.zeros((1, C), jnp.float32),
            g2=jnp.ones((1, C), jnp.float32), b2=jnp.zeros((1, C), jnp.float32),
        ))

    return dict(conv_w=conv_w, conv_b=conv_b, ln_g=ln_g, ln_b=ln_b, layers=layers)


# ---------------------------------------------------------------------------
# TODO(synk): relative-position attention bias / gru_rel_pos and key padding /
#             streaming masks are disabled in this config (as in WavLM-Base
#             default forward with None masks); not implemented here.
# ---------------------------------------------------------------------------
if __name__ == "__main__":
    B, T, C = 2, 16, 32          # batch, time, encoder_embed_dim
    H, F_FFN = 4, 64             # heads, ffn dim
    K, G = 8, 4                  # conv_pos, conv_pos_groups
    L = 2                        # encoder_layers
    T_TILE = 8                   # FFN row-tile (128 at real scale)

    key = jax.random.PRNGKey(0)
    kx, kp = jax.random.split(key)
    x = jax.random.normal(kx, (B, T, C), jnp.float32)
    params = init_params(kp, C=C, F=F_FFN, K=K, G=G, L=L)

    y, layer_results = transformer_encoder(x, params, K=K, H=H, t_tile=T_TILE)
    jax.block_until_ready(y)
    assert y.shape == (B, T, C) and y.dtype == jnp.float32
    print("KERNEL_OK")
</pallas_src>

<mosaic_0001>
module attributes {stable_mosaic.version = 11 : i64} {
  func.func @_probe_kernel(%arg0: i32, %arg1: memref<8x128xf32, #tpu.memory_space<vmem>>, %arg2: memref<8x128xf32, #tpu.memory_space<vmem>>) attributes {dimension_semantics = [#tpu.dimension_semantics<arbitrary>], iteration_bounds = array<i64: 1>, scalar_prefetch = 0 : i64, scratch_operands = 0 : i64, tpu.core_type = #tpu.core_type<tc>, window_params = [{pipeline_mode = #tpu.pipeline_mode<synchronous>, transform_indices = @transform_0, window_bounds = array<i64: 8, 128>}, {pipeline_mode = #tpu.pipeline_mode<synchronous>, transform_indices = @transform_1, window_bounds = array<i64: 8, 128>}]} {
    %c0 = arith.constant 0 : index
    %c0_0 = arith.constant 0 : index
    %0 = vector.load %arg1[%c0, %c0_0] : memref<8x128xf32, #tpu.memory_space<vmem>>, vector<8x128xf32>
    %c0_1 = arith.constant 0 : index
    %c0_2 = arith.constant 0 : index
    %1 = vector.load %arg2[%c0_1, %c0_2] : memref<8x128xf32, #tpu.memory_space<vmem>>, vector<8x128xf32>
    tpu.vector_store %arg2[%c0_1, %c0_2], %0 {strides = array<i32>} : memref<8x128xf32, #tpu.memory_space<vmem>>, vector<8x128xf32>,
    return
  }
  func.func @transform_0(%arg0: i32) -> (i32, i32) {
    %c0_i32 = arith.constant 0 : i32
    %c0_i32_0 = arith.constant 0 : i32
    %c0_i32_1 = arith.constant 0 : i32
    return %c0_i32, %c0_i32_0 : i32, i32
  }
  func.func @transform_1(%arg0: i32) -> (i32, i32) {
    %c0_i32 = arith.constant 0 : i32
    %c0_i32_0 = arith.constant 0 : i32
    %c0_i32_1 = arith.constant 0 : i32
    return %c0_i32, %c0_i32_0 : i32, i32
  }
}

module attributes {stable_mosaic.version = 11 : i64} {
  func.func @posconv_ln_kernel(%arg0: i32, %arg1: memref<1x24x32xf32, #tpu.memory_space<vmem>>, %arg2: memref<8x32x32xbf16, #tpu.memory_space<vmem>>, %arg3: memref<1x32xf32, #tpu.memory_space<vmem>>, %arg4: memref<1x32xf32, #tpu.memory_space<vmem>>, %arg5: memref<1x32xf32, #tpu.memory_space<vmem>>, %arg6: memref<1x16x32xf32, #tpu.memory_space<vmem>>) attributes {dimension_semantics = [#tpu.dimension_semantics<parallel>], iteration_bounds = array<i64: 2>, scalar_prefetch = 0 : i64, scratch_operands = 0 : i64, tpu.core_type = #tpu.core_type<tc>, window_params = [{transform_indices = @transform_0, window_bounds = array<i64: 1, 24, 32>}, {pipeline_mode = #tpu.pipeline_mode<synchronous>, transform_indices = @transform_1, window_bounds = array<i64: 8, 32, 32>}, {pipeline_mode = #tpu.pipeline_mode<synchronous>, transform_indices = @transform_2, window_bounds = array<i64: 1, 32>}, {pipeline_mode = #tpu.pipeline_mode<synchronous>, transform_indices = @transform_3, window_bounds = array<i64: 1, 32>}, {pipeline_mode = #tpu.pipeline_mode<synchronous>, transform_indices = @transform_4, window_bounds = array<i64: 1, 32>}, {transform_indices = @transform_5, window_bounds = array<i64: 1, 16, 32>}]} {
    %c0 = arith.constant 0 : index
    %c0_0 = arith.constant 0 : index
    %c0_1 = arith.constant 0 : index
    %0 = vector.load %arg1[%c0, %c0_0, %c0_1] : memref<1x24x32xf32, #tpu.memory_space<vmem>>, vector<1x24x32xf32>
    %1 = vector.shape_cast %0 : vector<1x24x32xf32> to vector<24x32xf32>
    %2 = vector.extract_strided_slice %1 {offsets = [4, 0], sizes = [16, 32], strides = [1, 1]} : vector<24x32xf32> to vector<16x32xf32>
    %3 = arith.truncf %1 : vector<24x32xf32> to vector<24x32xbf16>
    %cst = arith.constant 0.000000e+00 : f32
    %4 = vector.broadcast %cst : f32 to vector<16x32xf32>
    %5 = vector.extract_strided_slice %3 {offsets = [0, 0], sizes = [16, 32], strides = [1, 1]} : vector<24x32xbf16> to vector<16x32xbf16>
    %c0_2 = arith.constant 0 : index
    %c0_3 = arith.constant 0 : index
    %c0_4 = arith.constant 0 : index
    %6 = vector.load %arg2[%c0_2, %c0_3, %c0_4] : memref<8x32x32xbf16, #tpu.memory_space<vmem>>, vector<1x32x32xbf16>
    %7 = vector.shape_cast %6 : vector<1x32x32xbf16> to vector<32x32xbf16>
    %cst_5 = arith.constant dense<0.000000e+00> : vector<16x32xf32>
    %8 = tpu.matmul %5, %7, %cst_5 {dimension_numbers = #tpu.dot_dimension_numbers<[1], [0], [0], [1], [0, 0, 1, 1], [], []>} : vector<16x32xbf16>, vector<32x32xbf16>, vector<16x32xf32> -> vector<16x32xf32>
    %9 = arith.addf %4, %8 : vector<16x32xf32>
    %10 = vector.extract_strided_slice %3 {offsets = [1, 0], sizes = [16, 32], strides = [1, 1]} : vector<24x32xbf16> to vector<16x32xbf16>
    %c1 = arith.constant 1 : index
    %c0_6 = arith.constant 0 : index
    %c0_7 = arith.constant 0 : index
    %11 = vector.load %arg2[%c1, %c0_6, %c0_7] : memref<8x32x32xbf16, #tpu.memory_space<vmem>>, vector<1x32x32xbf16>
    %12 = vector.shape_cast %11 : vector<1x32x32xbf16> to vector<32x32xbf16>
    %cst_8 = arith.constant dense<0.000000e+00> : vector<16x32xf32>
    %13 = tpu.matmul %10, %12, %cst_8 {dimension_numbers = #tpu.dot_dimension_numbers<[1], [0], [0], [1], [0, 0, 1, 1], [], []>} : vector<16x32xbf16>, vector<32x32xbf16>, vector<16x32xf32> -> vector<16x32xf32>
    %14 = arith.addf %9, %13 : vector<16x32xf32>
    %15 = vector.extract_strided_slice %3 {offsets = [2, 0], sizes = [16, 32], strides = [1, 1]} : vector<24x32xbf16> to vector<16x32xbf16>
    %c2 = arith.constant 2 : index
    %c0_9 = arith.constant 0 : index
    %c0_10 = arith.constant 0 : index
    %16 = vector.load %arg2[%c2, %c0_9, %c0_10] : memref<8x32x32xbf16, #tpu.memory_space<vmem>>, vector<1x32x32xbf16>
    %17 = vector.shape_cast %16 : vector<1x32x32xbf16> to vector<32x32xbf16>
    %cst_11 = arith.constant dense<0.000000e+00> : vector<16x32xf32>
    %18 = tpu.matmul %15, %17, %cst_11 {dimension_numbers = #tpu.dot_dimension_numbers<[1], [0], [0], [1], [0, 0, 1, 1], [], []>} : vector<16x32xbf16>, vector<32x32xbf16>, vector<16x32xf32> -> vector<16x32xf32>
    %19 = arith.addf %14, %18 : vector<16x32xf32>
    %20 = vector.extract_strided_slice %3 {offsets = [3, 0], sizes = [16, 32], strides = [1, 1]} : vector<24x32xbf16> to vector<16x32xbf16>
    %c3 = arith.constant 3 : index
    %c0_12 = arith.constant 0 : index
    %c0_13 = arith.constant 0 : index
    %21 = vector.load %arg2[%c3, %c0_12, %c0_13] : memref<8x32x32xbf16, #tpu.memory_space<vmem>>, vector<1x32x32xbf16>
    %22 = vector.shape_cast %21 : vector<1x32x32xbf16> to vector<32x32xbf16>
    %cst_14 = arith.constant dense<0.000000e+00> : vector<16x32xf32>
    %23 = tpu.matmul %20, %22, %cst_14 {dimension_numbers = #tpu.dot_dimension_numbers<[1], [0], [0], [1], [0, 0, 1, 1], [], []>} : vector<16x32xbf16>, vector<32x32xbf16>, vector<16x32xf32> -> vector<16x32xf32>
    %24 = arith.addf %19, %23 : vector<16x32xf32>
    %25 = vector.extract_strided_slice %3 {offsets = [4, 0], sizes = [16, 32], strides = [1, 1]} : vector<24x32xbf16> to vector<16x32xbf16>
    %c4 = arith.constant 4 : index
    %c0_15 = arith.constant 0 : index
    %c0_16 = arith.constant 0 : index
    %26 = vector.load %arg2[%c4, %c0_15, %c0_16] : memref<8x32x32xbf16, #tpu.memory_space<vmem>>, vector<1x32x32xbf16>
    %27 = vector.shape_cast %26 : vector<1x32x32xbf16> to vector<32x32xbf16>
    %cst_17 = arith.constant dense<0.000000e+00> : vector<16x32xf32>
    %28 = tpu.matmul %25, %27, %cst_17 {dimension_numbers = #tpu.dot_dimension_numbers<[1], [0], [0], [1], [0, 0, 1, 1], [], []>} : vector<16x32xbf16>, vector<32x32xbf16>, vector<16x32xf32> -> vector<16x32xf32>
    %29 = arith.addf %24, %28 : vector<16x32xf32>
    %30 = vector.extract_strided_slice %3 {offsets = [5, 0], sizes = [16, 32], strides = [1, 1]} : vector<24x32xbf16> to vector<16x32xbf16>
    %c5 = arith.constant 5 : index
    %c0_18 = arith.constant 0 : index
    %c0_19 = arith.constant 0 : index
    %31 = vector.load %arg2[%c5, %c0_18, %c0_19] : memref<8x32x32xbf16, #tpu.memory_space<vmem>>, vector<1x32x32xbf16>
    %32 = vector.shape_cast %31 : vector<1x32x32xbf16> to vector<32x32xbf16>
    %cst_20 = arith.constant dense<0.000000e+00> : vector<16x32xf32>
    %33 = tpu.matmul %30, %32, %cst_20 {dimension_numbers = #tpu.dot_dimension_numbers<[1], [0], [0], [1], [0, 0, 1, 1], [], []>} : vector<16x32xbf16>, vector<32x32xbf16>, vector<16x32xf32> -> vector<16x32xf32>
    %34 = arith.addf %29, %33 : vector<16x32xf32>
    %35 = vector.extract_strided_slice %3 {offsets = [6, 0], sizes = [16, 32], strides = [1, 1]} : vector<24x32xbf16> to vector<16x32xbf16>
    %c6 = arith.constant 6 : index
    %c0_21 = arith.constant 0 : index
    %c0_22 = arith.constant 0 : index
    %36 = vector.load %arg2[%c6, %c0_21, %c0_22] : memref<8x32x32xbf16, #tpu.memory_space<vmem>>, vector<1x32x32xbf16>
    %37 = vector.shape_cast %36 : vector<1x32x32xbf16> to vector<32x32xbf16>
    %cst_23 = arith.constant dense<0.000000e+00> : vector<16x32xf32>
    %38 = tpu.matmul %35, %37, %cst_23 {dimension_numbers = #tpu.dot_dimension_numbers<[1], [0], [0], [1], [0, 0, 1, 1], [], []>} : vector<16x32xbf16>, vector<32x32xbf16>, vector<16x32xf32> -> vector<16x32xf32>
    %39 = arith.addf %34, %38 : vector<16x32xf32>
    %40 = vector.extract_strided_slice %3 {offsets = [7, 0], sizes = [16, 32], strides = [1, 1]} : vector<24x32xbf16> to vector<16x32xbf16>
    %c7 = arith.constant 7 : index
    %c0_24 = arith.constant 0 : index
    %c0_25 = arith.constant 0 : index
    %41 = vector.load %arg2[%c7, %c0_24, %c0_25] : memref<8x32x32xbf16, #tpu.memory_space<vmem>>, vector<1x32x32xbf16>
    %42 = vector.shape_cast %41 : vector<1x32x32xbf16> to vector<32x32xbf16>
    %cst_26 = arith.constant dense<0.000000e+00> : vector<16x32xf32>
    %43 = tpu.matmul %40, %42, %cst_26 {dimension_numbers = #tpu.dot_dimension_numbers<[1], [0], [0], [1], [0, 0, 1, 1], [], []>} : vector<16x32xbf16>, vector<32x32xbf16>, vector<16x32xf32> -> vector<16x32xf32>
    %44 = arith.addf %39, %43 : vector<16x32xf32>
    %c0_27 = arith.constant 0 : index
    %c0_28 = arith.constant 0 : index
    %45 = vector.load %arg3[%c0_27, %c0_28] : memref<1x32xf32, #tpu.memory_space<vmem>>, vector<1x32xf32>
    %46 = vector.broadcast %45 : vector<1x32xf32> to vector<16x32xf32>
    %47 = arith.addf %44, %46 : vector<16x32xf32>
    %cst_29 = arith.constant 5.000000e-01 : f32
    %48 = vector.broadcast %cst_29 : f32 to vector<16x32xf32>
    %49 = arith.mulf %48, %47 : vector<16x32xf32>
    %cst_30 = arith.constant 0.707106769 : f32
    %50 = vector.broadcast %cst_30 : f32 to vector<16x32xf32>
    %51 = arith.mulf %47, %50 : vector<16x32xf32>
    %52 = math.erf %51 : vector<16x32xf32>
    %cst_31 = arith.constant 1.000000e+00 : f32
    %53 = vector.broadcast %cst_31 : f32 to vector<16x32xf32>
    %54 = arith.addf %53, %52 : vector<16x32xf32>
    %55 = arith.mulf %49, %54 : vector<16x32xf32>
    %56 = arith.addf %2, %55 : vector<16x32xf32>
    %c0_32 = arith.constant 0 : index
    %c0_33 = arith.constant 0 : index
    %57 = vector.load %arg4[%c0_32, %c0_33] : memref<1x32xf32, #tpu.memory_space<vmem>>, vector<1x32xf32>
    %c0_34 = arith.constant 0 : index
    %c0_35 = arith.constant 0 : index
    %58 = vector.load %arg5[%c0_34, %c0_35] : memref<1x32xf32, #tpu.memory_space<vmem>>, vector<1x32xf32>
    %cst_36 = arith.constant dense<0.000000e+00> : vector<16xf32>
    %59 = vector.multi_reduction <add>, %56, %cst_36 [1] : vector<16x32xf32> to vector<16xf32>
    %60 = vector.shape_cast %59 : vector<16xf32> to vector<16x1xf32>
    %cst_37 = arith.constant 3.200000e+01 : f32
    %61 = vector.broadcast %cst_37 : f32 to vector<16x1xf32>
    %62 = arith.divf %60, %61 : vector<16x1xf32>
    %63 = vector.broadcast %62 : vector<16x1xf32> to vector<16x32xf32>
    %64 = arith.subf %56, %63 : vector<16x32xf32>
    %65 = arith.mulf %64, %64 : vector<16x32xf32>
    %cst_38 = arith.constant dense<0.000000e+00> : vector<16xf32>
    %66 = vector.multi_reduction <add>, %65, %cst_38 [1] : vector<16x32xf32> to vector<16xf32>
    %67 = vector.shape_cast %66 : vector<16xf32> to vector<16x1xf32>
    %cst_39 = arith.constant 3.200000e+01 : f32
    %68 = vector.broadcast %cst_39 : f32 to vector<16x1xf32>
    %69 = arith.divf %67, %68 : vector<16x1xf32>
    %70 = vector.broadcast %62 : vector<16x1xf32> to vector<16x32xf32>
    %71 = arith.subf %56, %70 : vector<16x32xf32>
    %cst_40 = arith.constant 9.99999974E-6 : f32
    %72 = vector.broadcast %cst_40 : f32 to vector<16x1xf32>
    %73 = arith.addf %69, %72 : vector<16x1xf32>
    %74 = math.rsqrt %73 : vector<16x1xf32>
    %75 = vector.broadcast %74 : vector<16x1xf32> to vector<16x32xf32>
    %76 = arith.mulf %71, %75 : vector<16x32xf32>
    %77 = vector.broadcast %57 : vector<1x32xf32> to vector<16x32xf32>
    %78 = arith.mulf %76, %77 : vector<16x32xf32>
    %79 = vector.broadcast %58 : vector<1x32xf32> to vector<16x32xf32>
    %80 = arith.addf %78, %79 : vector<16x32xf32>
    %c0_41 = arith.constant 0 : index
    %c0_42 = arith.constant 0 : index
    %c0_43 = arith.constant 0 : index
    %81 = vector.load %arg6[%c0_41, %c0_42, %c0_43] : memref<1x16x32xf32, #tpu.memory_space<vmem>>, vector<1x16x32xf32>
    %82 = vector.shape_cast %81 : vector<1x16x32xf32> to vector<16x32xf32>
    %83 = vector.shape_cast %80 : vector<16x32xf32> to vector<1x16x32xf32>
    tpu.vector_store %arg6[%c0_41, %c0_42, %c0_43], %83 {strides = array<i32>} : memref<1x16x32xf32, #tpu.memory_space<vmem>>, vector<1x16x32xf32>,
    return
  }
  func.func @transform_0(%arg0: i32) -> (i32, i32, i32) {
    %c0_i32 = arith.constant 0 : i32
    %c0_i32_0 = arith.constant 0 : i32
    %c0_i32_1 = arith.constant 0 : i32
    return %arg0, %c0_i32, %c0_i32_0 : i32, i32, i32
  }
  func.func @transform_1(%arg0: i32) -> (i32, i32, i32) {
    %c0_i32 = arith.constant 0 : i32
    %c0_i32_0 = arith.constant 0 : i32
    %c0_i32_1 = arith.constant 0 : i32
    %c0_i32_2 = arith.constant 0 : i32
    return %c0_i32, %c0_i32_0, %c0_i32_1 : i32, i32, i32
  }
  func.func @transform_2(%arg0: i32) -> (i32, i32) {
    %c0_i32 = arith.constant 0 : i32
    %c0_i32_0 = arith.constant 0 : i32
    %c0_i32_1 = arith.constant 0 : i32
    return %c0_i32, %c0_i32_0 : i32, i32
  }
  func.func @transform_3(%arg0: i32) -> (i32, i32) {
    %c0_i32 = arith.constant 0 : i32
    %c0_i32_0 = arith.constant 0 : i32
    %c0_i32_1 = arith.constant 0 : i32
    return %c0_i32, %c0_i32_0 : i32, i32
  }
  func.func @transform_4(%arg0: i32) -> (i32, i32) {
    %c0_i32 = arith.constant 0 : i32
    %c0_i32_0 = arith.constant 0 : i32
    %c0_i32_1 = arith.constant 0 : i32
    return %c0_i32, %c0_i32_0 : i32, i32
  }
  func.func @transform_5(%arg0: i32) -> (i32, i32, i32) {
    %c0_i32 = arith.constant 0 : i32
    %c0_i32_0 = arith.constant 0 : i32
    %c0_i32_1 = arith.constant 0 : i32
    return %arg0, %c0_i32, %c0_i32_0 : i32, i32, i32
  }
}

</mosaic_0001>

<bundles_post_ra>
// kernel: tpu_custom_call.1
= control target key start
LH: loop header
LB: loop body
LE: loop exit
PB: predicated region body
PF: predicated region fallthrough
CT: control target
= control target key end

     0   :  { %6 = vsyncpa [#allocation3], 0  ;;  %s102_s0 = inlined_call_operand.hbm [shape: f32[8,128], index: 0, kind: input, shape index: {}]   ;;  %s103_s1 = inlined_call_operand.hbm [shape: f32[8,128], index: 1, kind: output, shape index: {}]  }
   0x1   :  { %7 = vsyncpa [#allocation4], 0  ;;  %s84_s6 = smov [#allocation2]  }
   0x2   :  { %s14_s7 = sshll.u32 %s84_s6, 4  ;;  %s15_s7 = int_to_ptr.vmem [resolvable:$true] %s14_s7 }
   0x3   :  { %s48_s8 = scalar_lea.vmem %s15_s7, 128  ;;  %p53_p1 = scmp.lt.s32.totalorder %s15_s7, %s15_s7 }
   0x4   :  { %p49_p0 = scmp.ne.s32.totalorder %s15_s7, %s48_s8  ;;  %p54_p2 = scmp.lt.s32.totalorder %s48_s8, %s48_s8 }
   0x6   :  { %p55_p3 = por %p54_p2, %p53_p1 }
   0x8   :  { %p56_p4 = pnand %p55_p3, %p49_p0 }
   0xa   :  { %59 = shalt.err (!%p56_p4)
}
   0xb   :  { %17 = dma.hbm_to_vmem [thread:$0]  %s102_s0, 128, %s15_s7, [#allocation3]  }
   0xc   :  { %80 = dma.done.wait [#allocation3], 128  }
   0xd   :  { %81 = vsyncadd [#allocation3], 4294967168  ;;  %s85_s11 = smov [#allocation5]   ;;  %v21_v0 = vld [vmem:[#allocation2] sm:$0xff] }
   0xe   :  { %s29_s12 = sshll.u32 %s85_s11, 4  ;;  %22 = vst [vmem:[#allocation5] sm:$0xff] %v21_v0  ;;  %s30_s12 = int_to_ptr.vmem [resolvable:$true] %s29_s12 }
   0xf   :  { %s60_s13 = scalar_lea.vmem %s30_s12, 128  ;;  %p65_p6 = scmp.lt.s32.totalorder %s30_s12, %s30_s12 }
  0x10   :  { %p61_p5 = scmp.ne.s32.totalorder %s30_s12, %s60_s13  ;;  %p66_p7 = scmp.lt.s32.totalorder %s60_s13, %s60_s13 }
  0x12   :  { %p67_p8 = por %p66_p7, %p65_p6 }
  0x14   :  { %p68_p9 = pnand %p67_p8, %p61_p5 }
  0x16   :  { %71 = shalt.err (!%p68_p9)
}
  0x17   :  { %32 = dma.vmem_to_hbm [thread:$0]  %s30_s12, 128, %s103_s1, [#allocation4]  }
  0x18   :  { %82 = dma.done.wait [#allocation4], 128  }
  0x19   :  { %83 = vsyncadd [#allocation4], 4294967168 }
  0x1a   :  { %36 = vsyncpa [#allocation3], 1 }
  0x1b   :  { %37 = vsyncpa [#allocation4], 1 }

// kernel: tpu_custom_call.1
= control target key start
LH: loop header
LB: loop body
LE: loop exit
PB: predicated region body
PF: predicated region fallthrough
CT: control target
= control target key end

     0   :  { %10 = vsyncpa [#allocation3], 0  ;;  %s1686_s0 = inlined_call_operand.hbm [shape: f32[2,24,32], index: 0, kind: input, shape index: {}]   ;;  %s1687_s1 = inlined_call_operand.hbm [shape: bf16[8,32,32], index: 1, kind: input, shape index: {}]   ;;  %s1688_s2 = inlined_call_operand.vmem [shape: f32[1,32], index: 2, kind: input, shape index: {}]   ;;  %s1689_s3 = inlined_call_operand.vmem [shape: f32[1,32], index: 3, kind: input, shape index: {}]   ;;  %s1690_s4 = inlined_call_operand.vmem [shape: f32[1,32], index: 4, kind: input, shape index: {}]   ;;  %s1691_s5 = inlined_call_operand.hbm [shape: f32[2,16,32], index: 5, kind: output, shape index: {}]  }
   0x1   :  { %12 = vsyncpa [#allocation3 + $0x1], 0 }
   0x2   :  { %13 = vsyncpa [#allocation6], 0 }
   0x3   :  { %14 = vsyncpa [#allocation4], 0 }
   0x4   :  { %16 = vsyncpa [#allocation4 + $0x1], 0  ;;  %s1397_s18 = smov 0   ;;  %s1399_s19 = smov 0  }
   0x5   :  { %s1401_s20 = smov 0   ;;  %s1403_s21 = smov 0  }
   0x6 LB: > { %s1418_s22 = sadd.s32 4294967295, %s1354_s21   ;;  %s1009_s23 = sadd.s32 4294967294, %s1354_s21   ;;  %s1354_s21 = sphi %s1403_s21, %s1713_s21   ;;  %s1350_s20 = sphi %s1401_s20, %s1712_s20   ;;  %s1346_s19 = sphi %s1399_s19, %s1711_s19   ;;  %s1342_s18 = sphi %s1397_s18, %s1710_s18  }
   0x7   : > { %p42_p0 = scmp.ne.s32.totalorder %s1346_s19, %s1342_s18  ;;  %p1692_p1 = scmp.eq.s32.totalorder %s1418_s22, 0 }
   0x8   : > { %p156_p3 = scmp.eq.s32.totalorder %s1009_s23, 1  ;;  %p1010_p5 = scmp.ge.s32.totalorder %s1354_s21, 1 }
   0x9   : > { %p1427_p4 = por %p1692_p1, %p42_p0  ;;  %p163_p7 = scmp.lt.s32.totalorder %s1354_s21, 3 }
   0xa   : > { %p1432_p6 = por %p156_p3, %p42_p0  ;;  %s1356_s27 = smov [#allocation5]  }
   0xb   : > { %s1696_s24 = scalar_select %p1427_p4, 1, 0 }
   0xc   : > { %s1697_s25 = scalar_select %p1432_p6, 1, 0 }
   0xd   : > { %p1437_p8 = pnand %p1010_p5, %p163_p7  ;;  %s175_s28 = sshll.u32 %s1356_s27, 4  ;;  %s176_s28 = int_to_ptr.vmem [resolvable:$true] %s175_s28 }
   0xe   : > { %s1451_s30 = sadd.s32 1, %s1354_s21   ;;  %s29_s6 = sadd.s32 1, %s1350_s20 }
   0xf   : > { %s1698_s26 = scalar_select %p1437_p8, 1, 0 }
  0x10   : > { %p1149_p9 = pneg %p1437_p8  ;;  %s26_s7 = ssub.s32 %s1354_s21, %s1451_s30 }
  0x11   : > { %s1243_s8 = scalar_lea.vmem %s176_s28, 2048  ;;  %p1251_p5 = scmp.lt.s32.totalorder %s176_s28, %s176_s28 }
  0x12   : > { %p1446_p11 = pnand %p1149_p9, %p1692_p1  ;;  %p1244_p13 = scmp.ne.s32.totalorder %s176_s28, %s1243_s8 }
  0x13   : > { %p1252_p7 = scmp.lt.s32.totalorder %s1243_s8, %s1243_s8 }
  0x14   : > { %p1234_p12 = pneg %p1446_p11 }
  0x15   : > { %p1253_p10 = por %p1252_p7, %p1251_p5 }
  0x16   : > { %p1246_p0 = pnand %p1244_p13, %p1234_p12 }
  0x18   : > { %p1247_p3 = pneg %p1246_p0 }
  0x1a   : > { %p1254_p2 = pnand %p1253_p10, %p1247_p3 }
  0x1c   : > { %1257 = shalt.err (!%p1254_p2)
}
  0x1d   : > { %s1357_s9 = smov 64   ;;  %s1358_s10 = smov 4  }
  0x1e   : > { %1152 = dma.hbm_to_vmem [thread:$0]  (!%p1446_p11), %s1687_s1, 2048, %s176_s28, [#allocation6], %s1357_s9, %s1357_s9, %s1358_s10  }
  0x1f   : > { %p27_p9 = scmp.eq.s32.totalorder %s26_s7, 0  ;;  %p36_p12 = scmp.ne.s32.totalorder %s1350_s20, %s1346_s19 }
  0x20   : > { %p37_p10 = scmp.eq.s32.totalorder %s1354_s21, 0  ;;  %p1162_p2 = scmp.lt.s32.totalorder %s1354_s21, 2 }
  0x21   : > { %s1468_s13 = scalar_select %p27_p9, %s1350_s20, %s29_s6  }
  0x22   : > { %p38_p13 = por %p37_p10, %p36_p12  ;;  %p1700_p0 = scmp.eq.s32.totalorder %s1418_s22, 1 }
  0x23   : > { %s198_s15 = sand.u32 1, %s1350_s20   ;;  %s1139_s16 = smul.u32 384, %s1354_s21 }
  0x24   : > { %p1472_p3 = por %p1700_p0, %p36_p12  ;;  %s1138_s17 = smul.u32 24, %s198_s15 }
  0x25   : > { %s1481_s29 = scalar_lea.hbm %s1686_s0, %s1139_s16  ;;  %p1483_p11 = pnand %p1162_p2, %p38_p13 }
  0x26   : > { %s1701_s14 = scalar_select %p1472_p3, 1, 0 }
  0x27   : > { %s202_s6 = scalar_lea.vmem [#allocation2], %s1138_s17  ;;  %s1489_s8 = scalar_lea.sflag [#allocation3], %s198_s15 }
  0x28   : > { %s209_s7 = sshll.u32 %s202_s6, 4  ;;  %s1258_s9 = scalar_lea.hbm %s1481_s29, 384  ;;  %s1487_s7 = int_to_ptr.vmem [resolvable:$true] %s209_s7 }
  0x29   : > { %p1259_p5 = scmp.ne.s32.totalorder %s1481_s29, %s1258_s9  ;;  %p1260_p7 = pneg %p1483_p11 }
  0x2a   : > { %s1263_s12 = scalar_lea.hbm %s1686_s0, 768  ;;  %p1264_p10 = scmp.lt.s32.totalorder %s1481_s29, %s1686_s0 }
  0x2b   : > { %p1261_p9 = pnand %p1260_p7, %p1259_p5  ;;  %p1265_p2 = scmp.lt.s32.totalorder %s1263_s12, %s1258_s9 }
  0x2d   : > { %p1262_p12 = pneg %p1261_p9  ;;  %p1266_p13 = por %p1265_p2, %p1264_p10 }
  0x2f   : > { %p1267_p0 = pnand %p1266_p13, %p1262_p12 }
  0x31   : > { %1270 = shalt.err (!%p1267_p0)
}
  0x32   : > { %s1271_s15 = scalar_lea.vmem %s1487_s7, 384  ;;  %s1359_s17 = smov [#allocation2]  }
  0x33   : > { %p1272_p1 = scmp.ne.s32.totalorder %s1487_s7, %s1271_s15  ;;  %s1276_s27 = sshll.u32 %s1359_s17, 4  ;;  %s1277_s27 = int_to_ptr.vmem [resolvable:$false] %s1276_s27 }
  0x34   : > { %s1278_s6 = scalar_lea.vmem %s1277_s27, 768  ;;  %p1279_p9 = scmp.lt.s32.totalorder %s1487_s7, %s1277_s27 }
  0x35   : > { %p1274_p6 = pnand %p1272_p1, %p1260_p7  ;;  %p1280_p3 = scmp.lt.s32.totalorder %s1278_s6, %s1271_s15 }
  0x37   : > { %p1275_p5 = pneg %p1274_p6  ;;  %p1281_p4 = por %p1280_p3, %p1279_p9 }
  0x39   : > { %p1282_p8 = pnand %p1281_p4, %p1275_p5 }
  0x3b   : > { %1285 = shalt.err (!%p1282_p8)
}
  0x3c   : > { %s1360_s9 = smov 128   ;;  %s1361_s10 = smov 8  }
  0x3d   : > { %1156 = dma.hbm_to_vmem [thread:$0]  (!%p1483_p11), %s1481_s29, 384, %s1487_s7, %s1489_s8, %s1360_s9, %s1360_s9, %s1361_s10  }
  0x3e   : > { %p1703_p1 = scmp.ne.s32.totalorder %s1698_s26, 0 }
  0x3f   : > { %s1513_s11 = sand.u32 (!%p1703_p1), 1, %s1346_s19   ;;  %p1704_p4 = scmp.ne.s32.totalorder (!%p1703_p1), %s1696_s24, 0 }
  0x40   : > { %221 = sbr.rel (%p1703_p1) target bundleno = 659 (0x293), region = 40  ;;  %s224_s16 = scalar_lea.sflag (!%p1703_p1), [#allocation3], %s1513_s11 }
  0x41   : > { %s1140_s12 = smul.u32 (!%p1703_p1), 24, %s1513_s11 }
  0x43   : > { %s227_s23 = scalar_lea.vmem (!%p1703_p1), [#allocation2], %s1140_s12 }
  0x45   : > { %1329 = dma.done.wait (%p1704_p4), %s224_s16, 384  }
  0x46   : > { %1331 = vsyncadd (%p1704_p4), %s224_s16, 4294966912  ;;  %p1705_p6 = scmp.eq.s32.totalorder %s1418_s22, 0 }
  0x48   : > { %1333 = dma.done.wait (%p1705_p6), [#allocation6], 2048   ;;  %p1706_p8 = pmov %p1705_p6 }
  0x49   : > { %v1362_v0 = vmov 0.0   ;;  %vm1363_vm0 = vmmov 0   ;;  %v1206_v1 = vld [vmem:[#allocation5 + $0x18] sm:$0xff]   ;;  %v1207_v2 = vld [vmem:[#allocation5 + $0x8] sm:$0xff]   ;;  %v1208_v3 = vld [vmem:[#allocation5 + $0x10] sm:$0xff]   ;;  %vm298_vm1 = vcmask 261120  }
  0x4a   : > { %1335 = vsyncadd (%p1706_p8), [#allocation6], 4294965248  ;;  %1074 = vmatprep.subr.bf16.mxu0 %v1362_v0  ;;  %1082 = vmatprep.subr.bf16.mxu1 %v1362_v0  ;;  %v1209_v4 = vld [vmem:[#allocation5] sm:$0xff]   ;;  %v1533_v5 = vld [vmem:[%s227_s23] sm:$0xff]  ;;  %vm273_vm2 = vsmask.f32 7424 }
  0x4b   : > { %1078 = vmatprep.mubr.msk.bf16.mxu0 %vm1363_vm0, %v1362_v0  ;;  %1086 = vmatprep.mubr.msk.bf16.mxu1 %vm1363_vm0, %v1362_v0  ;;  %v1535_v6 = vld [vmem:[%s227_s23 + $0x8] sm:$0xff]  ;;  %v1537_v7 = vld [vmem:[%s227_s23 + $0x10] sm:$0xff]  ;;  %v1210_v16 = vld [vmem:[#allocation5 + $0x28] sm:$0xff]   ;;  %vm405_vm3 = vcmask 1046528   ;;  %vm472_vm4 = vsmask.f32 6400 }
  0x4c   : > { %1075 = vmatpush3.bf16.msra.mxu0 %v1206_v1  ;;  %1083 = vmatpush3.bf16.msra.mxu1 %v1207_v2  ;;  %v1541_v8 = vpack.c.bf16 %v1535_v6, %v1533_v5  ;;  %v1545_v9 = vpack.c.bf16 %v1537_v7, %v1537_v7  ;;  %v1211_v13 = vld [vmem:[#allocation5 + $0x38] sm:$0xff]   ;;  %v1213_v17 = vld [vmem:[#allocation5 + $0x30] sm:$0xff]   ;;  %v1212_v26 = vld [vmem:[#allocation5 + $0x20] sm:$0xff]   ;;  %vm612_vm5 = vsmask.f32 5376  ;;  %vm545_vm6 = vcmask 1045504  }
  0x4d   : > { %1076 = vmatprep.subr.bf16.mxu0 %v1362_v0  ;;  %1084 = vmatprep.subr.bf16.mxu1 %v1362_v0  ;;  %v1215_v30 = vld [vmem:[#allocation5 + $0x58] sm:$0xff]   ;;  %v1214_v37 = vld [vmem:[#allocation5 + $0x48] sm:$0xff]   ;;  %v1217_v38 = vld [vmem:[#allocation5 + $0x50] sm:$0xff]   ;;  %vm750_vm7 = vsmask.f32 4352  ;;  %vm683_vm8 = vcmask 1044480  }
  0x4e   : > { %v1548_v10 = vshrl.u32 %v1541_v8, 16  ;;  %v1551_v11 = vshll.u32 %v1541_v8, 16  ;;  %v1554_v12 = vshll.u32 %v1545_v9, 16  ;;  %v1565_v20 = vshrl.u32 %v1545_v9, 16  ;;  %v1216_v44 = vld [vmem:[#allocation5 + $0x40] sm:$0xff]   ;;  %v1219_v46 = vld [vmem:[#allocation5 + $0x78] sm:$0xff]  }
  0x4f   : > { %v406_v27 = vrot.slane %v1541_v8, 1  ;;  %v407_v28 = vrot.slane %v1545_v9, 1  ;;  %v546_v41 = vrot.slane %v1541_v8, 2  ;;  %v547_v42 = vrot.slane %v1545_v9, 2  ;;  %v1218_v51 = vld [vmem:[#allocation5 + $0x68] sm:$0xff]   ;;  %v1221_v52 = vld [vmem:[#allocation5 + $0x70] sm:$0xff]  }
  0x50   : > { %1077 = vmatpush3.bf16.msra.mxu0 %v1208_v3  ;;  %1085 = vmatpush3.bf16.msra.mxu1 %v1209_v4  ;;  %v279_v14 = vrot.slane %v1551_v11, 1  ;;  %v284_v15 = vrot.slane %v1554_v12, 1  ;;  %v473_v18 = vrot.slane %v1548_v10, 1  ;;  %v474_v19 = vrot.slane %v1551_v11, 2  ;;  %v1220_v55 = vld [vmem:[#allocation5 + $0x60] sm:$0xff]   ;;  %s1016_s7 = sshll.u32 %s1513_s11, 4 }
  0x51   : > { %1090 = vmatprep.subr.bf16.mxu0 %v1362_v0  ;;  %1098 = vmatprep.subr.bf16.mxu1 %v1362_v0  ;;  %v479_v21 = vrot.slane %v1554_v12, 2  ;;  %v478_v24 = vrot.slane %v1565_v20, 1  ;;  %v613_v31 = vrot.slane %v1548_v10, 2  ;;  %v614_v32 = vrot.slane %v1551_v11, 3  ;;  %s1049_s17 = sshll.u32 %s1418_s22, 8  ;;  %s257_s27 = scalar_lea.vmem [#allocation7], %s1016_s7 }
  0x52   : > { %v280_v22 = vor.u32 %v279_v14, %v1548_v10  ;;  %v475_v23 = vor.u32 %v474_v19, %v473_v18  ;;  %v616_v33 = vrot.slane %v1565_v20, 2  ;;  %v617_v34 = vrot.slane %v1554_v12, 3  ;;  %s926_s6 = sshll.u32 %s257_s27, 4  ;;  %s1639_s12 = scalar_lea.hbm %s1691_s5, %s1049_s17  ;;  %s1641_s6 = int_to_ptr.vmem [resolvable:$true] %s926_s6 }
  0x53   : > { %1087 = vmatmul.mubr.msk.bf16.vlgmr.msra.gmra.mxu1 %vm298_vm1, %v1541_v8  ;;  %v480_v29 = vor.u32 %v479_v21, %v478_v24  ;;  %v408_v36 = vsel %vm405_vm3, %v406_v27, %v407_v28  ;;  %v615_v39 = vor.u32 %v614_v32, %v613_v31  ;;  %v751_v43 = vrot.slane %v1548_v10, 3  ;;  %s913_s22 = scalar_lea.sflag [#allocation4], %s1513_s11  ;;  %s1286_s16 = scalar_lea.vmem %s1641_s6, 256 }
  0x54   : > { %1099 = vmatpush3.bf16.msra.mxu1 %v1211_v13  ;;  %1102 = vmatprep.mubr.msk.bf16.mxu1 %vm1363_vm0, %v1362_v0  ;;  %v285_v25 = vsel %vm273_vm2, %v280_v22, %v284_v15  ;;  %v618_v40 = vor.u32 %v617_v34, %v616_v33  ;;  %v752_v47 = vrot.slane %v1551_v11, 4  ;;  %v754_v48 = vrot.slane %v1565_v20, 3  ;;  %p1287_p3 = scmp.ne.s32.totalorder %s1641_s6, %s1286_s16  ;;  %p1707_p11 = scmp.ne.s32.totalorder %s1701_s14, 0 }
  0x55   : > { %1100 = vmatprep.subr.bf16.mxu1 %v1362_v0  ;;  %1079 = vmatmul.mubr.msk.bf16.vlgmr.msra.gmra.mxu0 %vm298_vm1, %v285_v25  ;;  %v481_v35 = vsel %vm472_vm4, %v475_v23, %v480_v29  ;;  %v755_v49 = vrot.slane %v1554_v12, 4  ;;  %v548_v50 = vsel %vm545_vm6, %v546_v41, %v547_v42  ;;  %v684_v56 = vrot.slane %v1541_v8, 3  ;;  %s1364_s23 = smov [#allocation7]  }
  0x56   : > { %1091 = vmatpush3.bf16.msra.mxu0 %v1210_v16  ;;  %1094 = vmatprep.mubr.msk.bf16.mxu0 %vm1363_vm0, %v1362_v0  ;;  %v619_v45 = vsel %vm612_vm5, %v615_v39, %v618_v40  ;;  %v753_v53 = vor.u32 %v752_v47, %v751_v43  ;;  %v685_v57 = vrot.slane %v1545_v9, 3  ;;  %vm849_vm9 = vcmask 261124   ;;  %p1288_p7 = pnand %p1287_p3, %p1707_p11  ;;  %s1290_s24 = sshll.u32 %s1364_s23, 4  ;;  %s1291_s24 = int_to_ptr.vmem [resolvable:$false] %s1290_s24 }
  0x57   : > { %1092 = vmatprep.subr.bf16.mxu0 %v1362_v0  ;;  %v756_v54 = vor.u32 %v755_v49, %v754_v48  ;;  %vm837_vm10 = vcmask 1043456   ;;  %vm856_vm11 = vcmask 257024   ;;  %s1292_s26 = scalar_lea.vmem %s1291_s24, 512  ;;  %p1293_p10 = scmp.lt.s32.totalorder %s1641_s6, %s1291_s24 }
  0x58   : > { %1101 = vmatpush3.bf16.msra.mxu1 %v1213_v17  ;;  %v686_v59 = vsel %vm683_vm8, %v684_v56, %v685_v57  ;;  %p1289_p12 = pneg %p1288_p7  ;;  %p1294_p2 = scmp.lt.s32.totalorder %s1292_s26, %s1286_s16 }
  0x59   : > { %1114 = vmatprep.subr.bf16.mxu1 %v1362_v0  ;;  %v757_v58 = vsel %vm750_vm7, %v753_v53, %v756_v54 }
  0x5a   : > { %1093 = vmatpush3.bf16.msra.mxu0 %v1212_v26  ;;  %p1295_p13 = por %p1294_p2, %p1293_p10 }
  0x5b   : > { %1103 = vmatmul.mubr.msk.bf16.vlgmr.msra.gmra.mxu1 %vm298_vm1, %v481_v35  ;;  %1106 = vmatprep.subr.bf16.mxu0 %v1362_v0 }
  0x5c   : > { %1115 = vmatpush3.bf16.msra.mxu1 %v1215_v30  ;;  %1118 = vmatprep.mubr.msk.bf16.mxu1 %vm1363_vm0, %v1362_v0  ;;  %p1296_p0 = pnand %p1295_p13, %p1289_p12 }
  0x5d   : > { %1116 = vmatprep.subr.bf16.mxu1 %v1362_v0  ;;  %1095 = vmatmul.mubr.msk.bf16.vlgmr.msra.gmra.mxu0 %vm298_vm1, %v408_v36 }
  0x5e   : > { %1107 = vmatpush3.bf16.msra.mxu0 %v1214_v37  ;;  %1110 = vmatprep.mubr.msk.bf16.mxu0 %vm1363_vm0, %v1362_v0  ;;  %v1041_v37 = vld [vmem:[%s1688_s2] ss:$0 sm:$0xff] }
  0x5f   : > { %1108 = vmatprep.subr.bf16.mxu0 %v1362_v0 }
  0x60   : > { %1117 = vmatpush3.bf16.msra.mxu1 %v1217_v38 }
  0x61   : > { %1130 = vmatprep.subr.bf16.mxu1 %v1362_v0 }
  0x62   : > { %1109 = vmatpush3.bf16.msra.mxu0 %v1216_v44 }
  0x63   : > { %1119 = vmatmul.mubr.msk.bf16.vlgmr.msra.gmra.mxu1 %vm298_vm1, %v619_v45  ;;  %1122 = vmatprep.subr.bf16.mxu0 %v1362_v0 }
  0x64   : > { %1131 = vmatpush3.bf16.msra.mxu1 %v1219_v46  ;;  %1134 = vmatprep.mubr.msk.bf16.mxu1 %vm1363_vm0, %v1362_v0 }
  0x65   : > { %1132 = vmatprep.subr.bf16.mxu1 %v1362_v0  ;;  %1111 = vmatmul.mubr.msk.bf16.vlgmr.msra.gmra.mxu0 %vm298_vm1, %v548_v50 }
  0x66   : > { %1123 = vmatpush3.bf16.msra.mxu0 %v1218_v51  ;;  %1126 = vmatprep.mubr.msk.bf16.mxu0 %vm1363_vm0, %v1362_v0 }
  0x67   : > { %1124 = vmatprep.subr.bf16.mxu0 %v1362_v0 }
  0x68   : > { %1133 = vmatpush3.bf16.msra.mxu1 %v1221_v52 }
  0x6a   : > { %1125 = vmatpush3.bf16.msra.mxu0 %v1220_v55 }
  0x6b   : > { %1135 = vmatmul.mubr.msk.bf16.vlgmr.msra.gmra.mxu1 %vm298_vm1, %v757_v58 }
  0x6d   : > { %1127 = vmatmul.mubr.msk.bf16.vlgmr.msra.gmra.mxu0 %vm298_vm1, %v686_v59 }
 0x113   : > { %v391_v60 = vpop.f32.mrf.mxu1 }
 0x115   : > { %v1088_v61 = vpop.f32.mrf.mxu1  ;;  %v336_v62 = vpop.f32.mrf.mxu0 }
 0x116   : > { %v392_v13 = vadd.f32 %v391_v60, %v336_v62 }
 0x117   : > { %v394_v63 = vpop.f32.mrf.mxu1  ;;  %v1080_v1 = vpop.f32.mrf.mxu0 }
 0x119   : > { %v1089_v2 = vpop.f32.mrf.mxu1  ;;  %v339_v3 = vpop.f32.mrf.mxu0 }
 0x11a   : > { %v395_v19 = vadd.f32 %v394_v63, %v339_v3 }
 0x11b   : > { %v531_v4 = vpop.f32.mrf.mxu1  ;;  %v1081_v8 = vpop.f32.mrf.mxu0 }
 0x11d   : > { %v1104_v9 = vpop.f32.mrf.mxu1  ;;  %v458_v10 = vpop.f32.mrf.mxu0 }
 0x11e   : > { %v465_v16 = vadd.f32 %v458_v10, %v392_v13 }
 0x11f   : > { %v534_v11 = vpop.f32.mrf.mxu1  ;;  %v1096_v0 = vpop.f32.mrf.mxu0 }
 0x120   : > { %v538_v22 = vadd.f32 %v531_v4, %v465_v16 }
 0x121   : > { %v1105_v12 = vpop.f32.mrf.mxu1  ;;  %v461_v14 = vpop.f32.mrf.mxu0 }
 0x122   : > { %v466_v23 = vadd.f32 %v461_v14, %v395_v19 }
 0x123   : > { %v669_v15 = vpop.f32.mrf.mxu1  ;;  %v1097_v17 = vpop.f32.mrf.mxu0 }
 0x124   : > { %v539_v29 = vadd.f32 %v534_v11, %v466_v23 }
 0x125   : > { %v1120_v18 = vpop.f32.mrf.mxu1  ;;  %v598_v20 = vpop.f32.mrf.mxu0 }
 0x126   : > { %v605_v26 = vadd.f32 %v598_v20, %v538_v22 }
 0x127   : > { %v672_v21 = vpop.f32.mrf.mxu1  ;;  %v1112_v24 = vpop.f32.mrf.mxu0 }
 0x128   : > { %v676_v32 = vadd.f32 %v669_v15, %v605_v26 }
 0x129   : > { %v1121_v25 = vpop.f32.mrf.mxu1  ;;  %v601_v27 = vpop.f32.mrf.mxu0 }
 0x12a   : > { %v606_v33 = vadd.f32 %v601_v27, %v539_v29 }
 0x12b   : > { %v807_v28 = vpop.f32.mrf.mxu1  ;;  %v1113_v30 = vpop.f32.mrf.mxu0 }
 0x12c   : > { %v677_v40 = vadd.f32 %v672_v21, %v606_v33  ;;  %v1043_v30 = vld [vmem:[%s1690_s4] ss:$0 sm:$0xff] }
 0x12d   : > { %v1136_v31 = vpop.f32.mrf.mxu1  ;;  %v736_v34 = vpop.f32.mrf.mxu0 }
 0x12e   : > { %v743_v36 = vadd.f32 %v736_v34, %v676_v32 }
 0x12f   : > { %v810_v35 = vpop.f32.mrf.mxu1  ;;  %v1128_v38 = vpop.f32.mrf.mxu0 }
 0x130   : > { %v814_v41 = vadd.f32 %v807_v28, %v743_v36  ;;  %v1042_v28 = vld [vmem:[%s1689_s3] ss:$0 sm:$0xff] }
 0x131   : > { %v1137_v39 = vpop.f32.mrf.mxu1  ;;  %v739_v42 = vpop.f32.mrf.mxu0 }
 0x132   : > { %v823_v43 = vadd.f32 %v1041_v37, %v814_v41  ;;  %v744_v44 = vadd.f32 %v739_v42, %v677_v40 }
 0x133   : > { %v1129_v45 = vpop.f32.mrf.mxu0 }
 0x134   : > { %v827_v46 = vmul.f32 0.70710677, %v823_v43  ;;  %v815_v47 = vadd.f32 %v810_v35, %v744_v44  ;;  %v825_v51 = vmul.f32 0.5, %v823_v43 }
 0x136   : > { %1222 = verf.f32 %v827_v46  ;;  %v824_v48 = vadd.f32 %v1041_v37, %v815_v47 }
 0x138   : > { %v828_v49 = vmul.f32 0.70710677, %v824_v48  ;;  %v826_v55 = vmul.f32 0.5, %v824_v48 }
 0x13a   : > { %1224 = verf.f32 %v828_v49 }
 0x143   : > { %v1223_v50 = vpop.eup %1222 }
 0x144   : > { %v831_v52 = vadd.f32 1.0, %v1223_v50 }
 0x146   : > { %v833_v53 = vmul.f32 %v831_v52, %v825_v51 }
 0x147   : > { %v1225_v54 = vpop.eup %1224 }
 0x148   : > { %v838_v56 = vrot.slane %v833_v53, 4  ;;  %v832_v57 = vadd.f32 1.0, %v1225_v54 }
 0x14a   : > { %v844_v58 = vadd.f32 %v838_v56, %v1533_v5  ;;  %v834_v59 = vmul.f32 %v832_v57, %v826_v55 }
 0x14c   : > { %v850_v60 = vsel %vm849_vm9, %v844_v58, 0.0  ;;  %v839_v61 = vrot.slane %v834_v59, 4 }
 0x14d   : > { %851 = vadd.xlane.f32.xlu0 %v850_v60 }
 0x14e   : > { %v846_v62 = vadd.f32 %v839_v61, %v1537_v7  ;;  %v840_v63 = vsel %vm837_vm10, %v838_v56, %v839_v61 }
 0x14f   : > { %v845_v1 = vadd.f32 %v840_v63, %v1535_v6 }
 0x150   : > { %v857_v2 = vsel %vm856_vm11, %v846_v62, 0.0 }
 0x151   : > { %858 = vadd.xlane.f32.xlu1 %v857_v2  ;;  %v853_v3 = vsel %vm298_vm1, %v845_v1, 0.0 }
 0x152   : > { %854 = vadd.xlane.f32.xlu0 %v853_v3 }
 0x1d6   : > { %v852_v4 = vpop.xlane.xlu0 %851 }
 0x1d7   : > { %v861_v5 = vmul.f32 0.03125, %v852_v4 }
 0x1d9   : > { %v864_v8 = vsub.f32 %v844_v58, %v861_v5 }
 0x1da   : > { %v859_v9 = vpop.xlane.xlu1 %858 }
 0x1db   : > { %v863_v10 = vmul.f32 0.03125, %v859_v9  ;;  %v855_v11 = vpop.xlane.xlu0 %854  ;;  %v867_v0 = vmul.f32 %v864_v8, %v864_v8 }
 0x1dc   : > { %v862_v12 = vmul.f32 0.03125, %v855_v11 }
 0x1dd   : > { %v866_v13 = vsub.f32 %v846_v62, %v863_v10  ;;  %v870_v7 = vsel %vm849_vm9, %v867_v0, 0.0 }
 0x1de   : > { %v865_v14 = vsub.f32 %v845_v1, %v862_v12  ;;  %871 = vadd.xlane.f32.xlu1 %v870_v7 }
 0x1df   : > { %v869_v6 = vmul.f32 %v866_v13, %v866_v13 }
 0x1e0   : > { %v868_v15 = vmul.f32 %v865_v14, %v865_v14 }
 0x1e1   : > { %v876_v16 = vsel %vm856_vm11, %v869_v6, 0.0 }
 0x1e2   : > { %877 = vadd.xlane.f32.xlu1 %v876_v16  ;;  %v873_v17 = vsel %vm298_vm1, %v868_v15, 0.0 }
 0x1e3   : > { %874 = vadd.xlane.f32.xlu0 %v873_v17 }
 0x267   : > { %v872_v18 = vpop.xlane.xlu1 %871 }
 0x268   : > { %v879_v19 = vmul.f32 0.03125, %v872_v18 }
 0x26a   : > { %v882_v20 = vadd.f32 1e-05, %v879_v19 }
 0x26b   : > { %v878_v21 = vpop.xlane.xlu1 %877 }
 0x26c   : > { %1226 = vrsqrt.f32 %v882_v20  ;;  %v881_v22 = vmul.f32 0.03125, %v878_v21  ;;  %v875_v23 = vpop.xlane.xlu0 %874 }
 0x26d   : > { %v880_v24 = vmul.f32 0.03125, %v875_v23 }
 0x26e   : > { %v884_v25 = vadd.f32 1e-05, %v881_v22 }
 0x26f   : > { %v883_v26 = vadd.f32 1e-05, %v880_v24 }
 0x270   : > { %1228 = vrsqrt.f32 %v884_v25 }
 0x271   : > { %1230 = vrsqrt.f32 %v883_v26 }
 0x279   : > { %v1227_v27 = vpop.eup %1226 }
 0x27a   : > { %v888_v29 = vmul.f32 %v1227_v27, %v864_v8 }
 0x27c   : > { %v897_v31 = vmul.f32 %v1042_v28, %v888_v29 }
 0x27d   : > { %v1229_v32 = vpop.eup %1228 }
 0x27e   : > { %v1231_v33 = vpop.eup %1230  ;;  %v906_v34 = vadd.f32 %v1043_v30, %v897_v31  ;;  %v890_v35 = vmul.f32 %v1229_v32, %v866_v13 }
 0x27f   : > { %v889_v36 = vmul.f32 %v1231_v33, %v865_v14 }
 0x280   : > { %v899_v37 = vmul.f32 %v1042_v28, %v890_v35  ;;  %909 = vst.msk [vmem:[%s257_s27 - $0x4] sm:$0xf0] %vm849_vm9, %v906_v34 }
 0x281   : > { %v898_v38 = vmul.f32 %v1042_v28, %v889_v36 }
 0x282   : > { %v908_v39 = vadd.f32 %v1043_v30, %v899_v37 }
 0x283   : > { %v907_v40 = vadd.f32 %v1043_v30, %v898_v38 }
 0x284   : > { %911 = vst.msk [vmem:[%s257_s27 + $0xc] sm:$0xf] %vm856_vm11, %v908_v39 }
 0x285   : > { %910 = vst.msk [vmem:[%s257_s27 + $0x4] sm:$0xff] %vm298_vm1, %v907_v40 }
 0x286   : > { %1299 = shalt.err (!%p1296_p0)
}
 0x287   : > { %s1300_s29 = scalar_lea.hbm %s1639_s12, 256  ;;  %s1304_s8 = scalar_lea.hbm %s1691_s5, 512 }
 0x288   : > { %p1301_p5 = scmp.ne.s32.totalorder %s1639_s12, %s1300_s29  ;;  %p1305_p4 = scmp.lt.s32.totalorder %s1639_s12, %s1691_s5 }
 0x289   : > { %p1306_p6 = scmp.lt.s32.totalorder %s1304_s8, %s1300_s29 }
 0x28a   : > { %p1302_p9 = pnand %p1301_p5, %p1707_p11 }
 0x28b   : > { %p1307_p8 = por %p1306_p6, %p1305_p4 }
 0x28c   : > { %p1303_p1 = pneg %p1302_p9 }
 0x28e   : > { %p1308_p3 = pnand %p1307_p8, %p1303_p1 }
 0x290   : > { %1311 = shalt.err (!%p1308_p3)
}
 0x291   : > { %s1365_s27 = smov 128   ;;  %s1366_s9 = smov 8  }
 0x292   : > { %1147 = dma.vmem_to_hbm [thread:$0]  (%p1707_p11), %s1641_s6, 256, %s1639_s12, %s913_s22, %s1365_s27, %s1365_s27, %s1366_s9  }
 0x293 PF: > { %s941_s10 = sand.u32 1, %s1342_s18   ;;  %p1708_p7 = scmp.ne.s32.totalorder %s1697_s25, 0 }
 0x294   : > { %p1709_p12 = scmp.ge.s32.totalorder %s1354_s21, 2  ;;  %s942_s16 = scalar_lea.sflag [#allocation4], %s941_s10 }
 0x296   : > { %p1158_p10 = pnand %p1709_p12, %p1708_p7 }
 0x298   : > { %p1159_p2 = pneg %p1158_p10 }
 0x29a   : > { %1337 = dma.done.wait (%p1159_p2), %s942_s16, 256  }
 0x29b   : > { %1339 = vsyncadd (%p1159_p2), %s942_s16, 4294967040  ;;  %p19_p13 = scmp.ge.s32.totalorder %s1451_s30, 4   ;;  %s1710_s18 = smov %s1346_s19 }
 0x29c   : > { %s1711_s19 = smov %s1350_s20  ;;  %s1712_s20 = smov %s1468_s13 }
 0x29d   : > { %s1713_s21 = smov %s1451_s30  ;;  %21 = sbr.rel (!%p19_p13) target bundleno = 6 (0x6), region = 96 }
 0x2a2   :  { %947 = vsyncpa [#allocation3], 1 }
 0x2a3   :  { %949 = vsyncpa [#allocation3 + $0x1], 1 }
 0x2a4   :  { %950 = vsyncpa [#allocation6], 1 }
 0x2a5   :  { %951 = vsyncpa [#allocation4], 1 }
 0x2a6   :  { %953 = vsyncpa [#allocation4 + $0x1], 1 }

</bundles_post_ra>
